<compile_context>
chip_gen: v7x
topology: tpu7x:2x2x1
jax: 0.10.0
libtpu: 0.0.40
codegen_flags: <defaults>
</compile_context>

<pallas_src>
import jax
import jax.numpy as jnp
from jax import lax
from jax.experimental import pallas as pl
from jax.experimental.pallas import tpu as pltpu

_INV_SQRT2 = 0.7071067811865476
_MIN_GRID_STEPS = 8  # >= ~3-4 grid steps per TensorCore on v7x (2 TCs)


# --------------------------------------------------------------------------- #
# Kernel
# --------------------------------------------------------------------------- #
def gating_kernel(x_ref, ctx_ref, w1_ref, b1_ref, w2_ref, b2_ref, o_ref):
    dim = o_ref.shape[-1]
    x = x_ref[...]
    # When dim % 128 == 0 these slices are (8,128)-tile-aligned lane slices of
    # the VMEM tile -> no copy. For small dims it's a sub-vreg slice (test-only
    # path).
    u = x[:, :dim]
    v = x[:, dim:]

    # Context MLP: Linear(5, dim//2) -> exact GELU (erf) -> Linear(dim//2, dim),
    # f32 MXU accumulation for both tiny matmuls.
    ctx = ctx_ref[...].astype(jnp.float32)
    h = (jnp.dot(ctx, w1_ref[...].astype(jnp.float32),
                 preferred_element_type=jnp.float32)
         + b1_ref[...].astype(jnp.float32))
    h = 0.5 * h * (1.0 + lax.erf(h * jnp.float32(_INV_SQRT2)))
    g = (jnp.dot(h, w2_ref[...].astype(jnp.float32),
                 preferred_element_type=jnp.float32)
         + b2_ref[...].astype(jnp.float32))

    # Gate math: keep bf16 inputs in bf16 (halves vreg/VALU work on v6e/v7x);
    # f32 inputs (and anything else) computed in f32.
    gate_dtype = x.dtype if x.dtype == jnp.bfloat16 else jnp.float32
    u = u.astype(gate_dtype)
    v = v.astype(gate_dtype)
    g = g.astype(gate_dtype)

    hard_swish = u * jnp.clip(u + 3.0, 0.0, 6.0) * (1.0 / 6.0)
    o_ref[...] = (hard_swish * jax.nn.sigmoid(v + g)).astype(o_ref.dtype)


# --------------------------------------------------------------------------- #
# Wrapper helpers
# --------------------------------------------------------------------------- #
def _round_up(x, m):
    return ((x + m - 1) // m) * m


def _vmem_capacity_bytes():
    try:
        return int(pltpu.get_tpu_info().vmem_capacity_bytes)
    except Exception:
        return 64 * 1024 * 1024  # conservative default: v7x per-TensorCore VMEM


def _per_row_vmem_bytes(dim, ctx_dim, x_itemsize):
    # Double-buffered x / ctx / out tiles per row (ctx lane-padded to 128, f32)
    ctx_lanes = _round_up(max(ctx_dim, 1), 128)
    per_row = 2 * (2 * dim * x_itemsize + ctx_lanes * 4 + dim * x_itemsize)
    # ~1.75x headroom for f32 elementwise/matmul intermediates (u, v, g, h).
    per_row += int(1.75 * 3 * dim * 4)
    return per_row


def _pick_row_tile(n_rows, per_row_bytes, weight_bytes, vmem_cap,
                   target_rows=2048):
    # ~40% of physical VMEM for live tiles; resident (double-buffered) weights
    # come out of that budget first.
    budget = int(0.40 * vmem_cap)
    avail = max(budget - 2 * weight_bytes, 1 << 20)

    rt = target_rows
    while rt > 8 and rt * per_row_bytes > avail:
        rt //= 2

    # Grid-length floor: keep >= _MIN_GRID_STEPS steps so both v7x cores are
    # fed and the DMA pipeline reaches steady state, before maximizing tiles.
    rt_grid_cap = _round_up(pl.cdiv(n_rows, _MIN_GRID_STEPS), 8)
    rt = max(8, min(rt, rt_grid_cap))
    return _round_up(rt, 8)


# --------------------------------------------------------------------------- #
# Public entry point
# --------------------------------------------------------------------------- #
def gating_unit(x, ctx, w1, b1, w2, b2, *, row_tile=None):
    """x: (B, S, 2*dim), ctx: (B, S, 5)  ->  (B, S, dim)."""
    B, S, two_dim = x.shape
    dim = two_dim // 2
    ctx_dim = ctx.shape[-1]
    N = B * S
    itemsize = jnp.dtype(x.dtype).itemsize
    weight_bytes = sum(int(a.size) * jnp.dtype(a.dtype).itemsize
                       for a in (w1, b1, w2, b2))

    vmem_cap = _vmem_capacity_bytes()
    per_row = _per_row_vmem_bytes(dim, ctx_dim, itemsize)
    if row_tile is None:
        row_tile = _pick_row_tile(N, per_row, weight_bytes, vmem_cap)
    else:
        row_tile = _round_up(max(row_tile, 8), 8)

    # vmem_limit: cover live tiles + weights + slack, stay under physical cap.
    vmem_limit = row_tile * per_row + 2 * weight_bytes + (8 << 20)
    vmem_limit = max(vmem_limit, 16 << 20)
    vmem_limit = min(vmem_limit, int(0.75 * vmem_cap))

    xf = x.reshape(N, two_dim)
    cf = ctx.reshape(N, ctx_dim)

    # No padding / tail slice: Pallas masks the ragged final block itself.
    grid = (pl.cdiv(N, row_tile),)

    in_specs = [
        pl.BlockSpec((row_tile, two_dim), lambda i: (i, 0)),   # x tile
        pl.BlockSpec((row_tile, ctx_dim), lambda i: (i, 0)),   # ctx tile
        pl.BlockSpec(w1.shape, lambda i: (0, 0)),
        pl.BlockSpec(b1.shape, lambda i: (0, 0)),
        pl.BlockSpec(w2.shape, lambda i: (0, 0)),
        pl.BlockSpec(b2.shape, lambda i: (0, 0)),
    ]
    out_spec = pl.BlockSpec((row_tile, dim), lambda i: (i, 0))

    cparams = pltpu.CompilerParams(
        dimension_semantics=("parallel",),   # shard row tiles across v7x's 2 TCs
        vmem_limit_bytes=int(vmem_limit),
    )

    out = pl.pallas_call(
        gating_kernel,
        out_shape=jax.ShapeDtypeStruct((N, dim), x.dtype),
        grid_spec=pltpu.PrefetchScalarGridSpec(
            num_scalar_prefetch=0,
            grid=grid,
            in_specs=in_specs,
            out_specs=out_spec,
        ),
        compiler_params=cparams,
    )(xf, cf, w1, b1, w2, b2)

    return out.reshape(B, S, dim)


# --------------------------------------------------------------------------- #
# Reference + test
# --------------------------------------------------------------------------- #
def reference(x, ctx, w1, b1, w2, b2):
    dim = x.shape[-1] // 2
    u, v = x[..., :dim], x[..., dim:]
    u = u * jnp.clip(u + 3.0, 0.0, 6.0) / 6.0
    h = ctx @ w1 + b1[0]
    h = 0.5 * h * (1.0 + lax.erf(h / jnp.sqrt(2.0)))
    g = h @ w2 + b2[0]
    return u * jax.nn.sigmoid(v + g)


def _run_case(key, B, S, dim):
    kx, kc, k1, k2, k3, k4 = jax.random.split(key, 6)
    x = jax.random.normal(kx, (B, S, 2 * dim), dtype=jnp.float32)
    ctx = jax.random.normal(kc, (B, S, 5), dtype=jnp.float32)
    # Shapes follow nn.Linear(5, dim//2) and nn.Linear(dim//2, dim).
    w1 = jax.random.normal(k1, (5, dim // 2), dtype=jnp.float32) * 0.3
    b1 = jax.random.normal(k2, (1, dim // 2), dtype=jnp.float32) * 0.1
    w2 = jax.random.normal(k3, (dim // 2, dim), dtype=jnp.float32) * 0.3
    b2 = jax.random.normal(k4, (1, dim), dtype=jnp.float32) * 0.1

    out = jax.block_until_ready(gating_unit(x, ctx, w1, b1, w2, b2))
    ref = reference(x, ctx, w1, b1, w2, b2)
    assert out.shape == (B, S, dim)
    assert jnp.allclose(out, ref, atol=2e-5, rtol=2e-5)


if __name__ == "__main__":
    key = jax.random.PRNGKey(0)
    k0, k1, k2 = jax.random.split(key, 3)
    # Lane-dense production-like path (dim % 128 == 0), even grid.
    _run_case(k0, B=2, S=8, dim=128)
    # Ragged token count (N = 15 not a multiple of row_tile): exercises the
    # Pallas-masked final block instead of wrapper-side pad/slice.
    _run_case(k1, B=3, S=5, dim=128)
    # Small-dim path (in-kernel sub-vreg split), same size as the original test.
    _run_case(k2, B=2, S=8, dim=32)
    print("KERNEL_OK")
</pallas_src>

<mosaic_0001>
module attributes {stable_mosaic.version = 11 : i64} {
  func.func @gating_kernel(%arg0: i32, %arg1: memref<8x256xf32, #tpu.memory_space<vmem>>, %arg2: memref<8x5xf32, #tpu.memory_space<vmem>>, %arg3: memref<5x64xf32, #tpu.memory_space<vmem>>, %arg4: memref<1x64xf32, #tpu.memory_space<vmem>>, %arg5: memref<64x128xf32, #tpu.memory_space<vmem>>, %arg6: memref<1x128xf32, #tpu.memory_space<vmem>>, %arg7: memref<8x128xf32, #tpu.memory_space<vmem>>) attributes {dimension_semantics = [#tpu.dimension_semantics<parallel>], iteration_bounds = array<i64: 2>, scalar_prefetch = 0 : i64, scratch_operands = 0 : i64, tpu.core_type = #tpu.core_type<tc>, window_params = [{transform_indices = @transform_0, window_bounds = array<i64: 8, 256>}, {transform_indices = @transform_1, window_bounds = array<i64: 8, 5>}, {pipeline_mode = #tpu.pipeline_mode<synchronous>, transform_indices = @transform_2, window_bounds = array<i64: 5, 64>}, {pipeline_mode = #tpu.pipeline_mode<synchronous>, transform_indices = @transform_3, window_bounds = array<i64: 1, 64>}, {pipeline_mode = #tpu.pipeline_mode<synchronous>, transform_indices = @transform_4, window_bounds = array<i64: 64, 128>}, {pipeline_mode = #tpu.pipeline_mode<synchronous>, transform_indices = @transform_5, window_bounds = array<i64: 1, 128>}, {transform_indices = @transform_6, window_bounds = array<i64: 8, 128>}]} {
    %c0 = arith.constant 0 : index
    %c0_0 = arith.constant 0 : index
    %0 = vector.load %arg1[%c0, %c0_0] : memref<8x256xf32, #tpu.memory_space<vmem>>, vector<8x256xf32>
    %1 = vector.extract_strided_slice %0 {offsets = [0, 0], sizes = [8, 128], strides = [1, 1]} : vector<8x256xf32> to vector<8x128xf32>
    %2 = vector.extract_strided_slice %0 {offsets = [0, 128], sizes = [8, 128], strides = [1, 1]} : vector<8x256xf32> to vector<8x128xf32>
    %c0_1 = arith.constant 0 : index
    %c0_2 = arith.constant 0 : index
    %3 = vector.load %arg2[%c0_1, %c0_2] : memref<8x5xf32, #tpu.memory_space<vmem>>, vector<8x5xf32>
    %c0_3 = arith.constant 0 : index
    %c0_4 = arith.constant 0 : index
    %4 = vector.load %arg3[%c0_3, %c0_4] : memref<5x64xf32, #tpu.memory_space<vmem>>, vector<5x64xf32>
    %cst = arith.constant dense<0.000000e+00> : vector<8x64xf32>
    %5 = tpu.matmul %3, %4, %cst {dimension_numbers = #tpu.dot_dimension_numbers<[1], [0], [0], [1], [0, 0, 1, 1], [], []>} : vector<8x5xf32>, vector<5x64xf32>, vector<8x64xf32> -> vector<8x64xf32>
    %c0_5 = arith.constant 0 : index
    %c0_6 = arith.constant 0 : index
    %6 = vector.load %arg4[%c0_5, %c0_6] : memref<1x64xf32, #tpu.memory_space<vmem>>, vector<1x64xf32>
    %7 = vector.broadcast %6 : vector<1x64xf32> to vector<8x64xf32>
    %8 = arith.addf %5, %7 : vector<8x64xf32>
    %cst_7 = arith.constant 5.000000e-01 : f32
    %9 = vector.broadcast %cst_7 : f32 to vector<8x64xf32>
    %10 = arith.mulf %9, %8 : vector<8x64xf32>
    %cst_8 = arith.constant 0.707106769 : f32
    %11 = vector.broadcast %cst_8 : f32 to vector<8x64xf32>
    %12 = arith.mulf %8, %11 : vector<8x64xf32>
    %13 = math.erf %12 : vector<8x64xf32>
    %cst_9 = arith.constant 1.000000e+00 : f32
    %14 = vector.broadcast %cst_9 : f32 to vector<8x64xf32>
    %15 = arith.addf %14, %13 : vector<8x64xf32>
    %16 = arith.mulf %10, %15 : vector<8x64xf32>
    %c0_10 = arith.constant 0 : index
    %c0_11 = arith.constant 0 : index
    %17 = vector.load %arg5[%c0_10, %c0_11] : memref<64x128xf32, #tpu.memory_space<vmem>>, vector<64x128xf32>
    %cst_12 = arith.constant dense<0.000000e+00> : vector<8x128xf32>
    %18 = tpu.matmul %16, %17, %cst_12 {dimension_numbers = #tpu.dot_dimension_numbers<[1], [0], [0], [1], [0, 0, 1, 1], [], []>} : vector<8x64xf32>, vector<64x128xf32>, vector<8x128xf32> -> vector<8x128xf32>
    %c0_13 = arith.constant 0 : index
    %c0_14 = arith.constant 0 : index
    %19 = vector.load %arg6[%c0_13, %c0_14] : memref<1x128xf32, #tpu.memory_space<vmem>>, vector<1x128xf32>
    %20 = vector.broadcast %19 : vector<1x128xf32> to vector<8x128xf32>
    %21 = arith.addf %18, %20 : vector<8x128xf32>
    %cst_15 = arith.constant 3.000000e+00 : f32
    %22 = vector.broadcast %cst_15 : f32 to vector<8x128xf32>
    %23 = arith.addf %1, %22 : vector<8x128xf32>
    %cst_16 = arith.constant 0.000000e+00 : f32
    %cst_17 = arith.constant 6.000000e+00 : f32
    %24 = vector.broadcast %cst_16 : f32 to vector<8x128xf32>
    %25 = arith.maximumf %24, %23 : vector<8x128xf32>
    %26 = vector.broadcast %cst_17 : f32 to vector<8x128xf32>
    %27 = arith.minimumf %26, %25 : vector<8x128xf32>
    %28 = arith.mulf %1, %27 : vector<8x128xf32>
    %cst_18 = arith.constant 0.166666672 : f32
    %29 = vector.broadcast %cst_18 : f32 to vector<8x128xf32>
    %30 = arith.mulf %28, %29 : vector<8x128xf32>
    %31 = arith.addf %2, %21 : vector<8x128xf32>
    %32 = arith.negf %31 : vector<8x128xf32>
    %33 = math.exp %32 : vector<8x128xf32>
    %cst_19 = arith.constant 1.000000e+00 : f32
    %34 = vector.broadcast %cst_19 : f32 to vector<8x128xf32>
    %35 = arith.addf %34, %33 : vector<8x128xf32>
    %36 = arith.divf %34, %35 : vector<8x128xf32>
    %37 = arith.mulf %30, %36 : vector<8x128xf32>
    %c0_20 = arith.constant 0 : index
    %c0_21 = arith.constant 0 : index
    %38 = vector.load %arg7[%c0_20, %c0_21] : memref<8x128xf32, #tpu.memory_space<vmem>>, vector<8x128xf32>
    tpu.vector_store %arg7[%c0_20, %c0_21], %37 {strides = array<i32>} : memref<8x128xf32, #tpu.memory_space<vmem>>, vector<8x128xf32>,
    return
  }
  func.func @transform_0(%arg0: i32) -> (i32, i32) {
    %c0_i32 = arith.constant 0 : i32
    %c0_i32_0 = arith.constant 0 : i32
    return %arg0, %c0_i32 : i32, i32
  }
  func.func @transform_1(%arg0: i32) -> (i32, i32) {
    %c0_i32 = arith.constant 0 : i32
    %c0_i32_0 = arith.constant 0 : i32
    return %arg0, %c0_i32 : i32, i32
  }
  func.func @transform_2(%arg0: i32) -> (i32, i32) {
    %c0_i32 = arith.constant 0 : i32
    %c0_i32_0 = arith.constant 0 : i32
    %c0_i32_1 = arith.constant 0 : i32
    return %c0_i32, %c0_i32_0 : i32, i32
  }
  func.func @transform_3(%arg0: i32) -> (i32, i32) {
    %c0_i32 = arith.constant 0 : i32
    %c0_i32_0 = arith.constant 0 : i32
    %c0_i32_1 = arith.constant 0 : i32
    return %c0_i32, %c0_i32_0 : i32, i32
  }
  func.func @transform_4(%arg0: i32) -> (i32, i32) {
    %c0_i32 = arith.constant 0 : i32
    %c0_i32_0 = arith.constant 0 : i32
    %c0_i32_1 = arith.constant 0 : i32
    return %c0_i32, %c0_i32_0 : i32, i32
  }
  func.func @transform_5(%arg0: i32) -> (i32, i32) {
    %c0_i32 = arith.constant 0 : i32
    %c0_i32_0 = arith.constant 0 : i32
    %c0_i32_1 = arith.constant 0 : i32
    return %c0_i32, %c0_i32_0 : i32, i32
  }
  func.func @transform_6(%arg0: i32) -> (i32, i32) {
    %c0_i32 = arith.constant 0 : i32
    %c0_i32_0 = arith.constant 0 : i32
    return %arg0, %c0_i32 : i32, i32
  }
}

</mosaic_0001>

<bundles_post_ra>
// kernel: tpu_custom_call.1
= control target key start
LH: loop header
LB: loop body
LE: loop exit
PB: predicated region body
PF: predicated region fallthrough
CT: control target
= control target key end

     0   :  { %11 = vsyncpa [#allocation3], 0  ;;  %s1129_s0 = inlined_call_operand.hbm [shape: f32[16,256], index: 0, kind: input, shape index: {}]   ;;  %s1130_s1 = inlined_call_operand.vmem [shape: f32[16,5], index: 1, kind: input, shape index: {}]   ;;  %s1131_s2 = inlined_call_operand.vmem [shape: f32[5,64], index: 2, kind: input, shape index: {}]   ;;  %s1132_s3 = inlined_call_operand.vmem [shape: f32[1,64], index: 3, kind: input, shape index: {}]   ;;  %s1133_s4 = inlined_call_operand.hbm [shape: f32[64,128], index: 4, kind: input, shape index: {}]   ;;  %s1134_s5 = inlined_call_operand.vmem [shape: f32[1,128], index: 5, kind: input, shape index: {}]   ;;  %s1135_s6 = inlined_call_operand.hbm [shape: f32[16,128], index: 6, kind: output, shape index: {}]  }
   0x1   :  { %13 = vsyncpa [#allocation3 + $0x1], 0 }
   0x2   :  { %14 = vsyncpa [#allocation6], 0 }
   0x3   :  { %15 = vsyncpa [#allocation4], 0 }
   0x4   :  { %17 = vsyncpa [#allocation4 + $0x1], 0  ;;  %s914_s21 = smov 0   ;;  %s916_s22 = smov 0  }
   0x5   :  { %s918_s23 = smov 0   ;;  %s920_s24 = smov 0  }
   0x6 LB: > { %s935_s25 = sadd.s32 4294967295, %s869_s24   ;;  %s603_s26 = sadd.s32 4294967294, %s869_s24   ;;  %s869_s24 = sphi %s920_s24, %s1155_s24   ;;  %s865_s23 = sphi %s918_s23, %s1154_s23   ;;  %s861_s22 = sphi %s916_s22, %s1153_s22   ;;  %s857_s21 = sphi %s914_s21, %s1152_s21  }
   0x7   : > { %p43_p0 = scmp.ne.s32.totalorder %s861_s22, %s857_s21  ;;  %p1136_p1 = scmp.eq.s32.totalorder %s935_s25, 0 }
   0x8   : > { %p183_p3 = scmp.eq.s32.totalorder %s603_s26, 1  ;;  %p604_p5 = scmp.ge.s32.totalorder %s869_s24, 1 }
   0x9   : > { %p944_p4 = por %p1136_p1, %p43_p0  ;;  %p190_p7 = scmp.lt.s32.totalorder %s869_s24, 3 }
   0xa   : > { %p949_p6 = por %p183_p3, %p43_p0  ;;  %s871_s30 = smov [#allocation5]  }
   0xb   : > { %s1139_s27 = scalar_select %p944_p4, 1, 0 }
   0xc   : > { %s1140_s28 = scalar_select %p949_p6, 1, 0 }
   0xd   : > { %p954_p8 = pnand %p604_p5, %p190_p7  ;;  %s208_s7 = sshll.u32 %s871_s30, 4  ;;  %s958_s7 = int_to_ptr.vmem [resolvable:$true] %s208_s7 }
   0xe   : > { %s970_s9 = sadd.s32 1, %s869_s24   ;;  %s30_s10 = sadd.s32 1, %s865_s23 }
   0xf   : > { %s1141_s29 = scalar_select %p954_p8, 1, 0 }
  0x10   : > { %p681_p9 = pneg %p954_p8  ;;  %s27_s11 = ssub.s32 %s869_s24, %s970_s9 }
  0x11   : > { %s741_s14 = scalar_lea.hbm %s1133_s4, 1024 }
  0x12   : > { %p965_p11 = pnand %p681_p9, %p1136_p1  ;;  %p742_p12 = scmp.ne.s32.totalorder %s1133_s4, %s741_s14 }
  0x13   : > { %p748_p5 = scmp.lt.u32.totalorder %s741_s14, %s1133_s4 }
  0x14   : > { %p743_p13 = pneg %p965_p11 }
  0x16   : > { %p744_p0 = pnand %p743_p13, %p742_p12 }
  0x18   : > { %p745_p3 = pneg %p744_p0 }
  0x1a   : > { %p750_p7 = pnand %p748_p5, %p745_p3 }
  0x1c   : > { %753 = shalt.err (!%p750_p7)
}
  0x1d   : > { %s754_s19 = scalar_lea.vmem %s958_s7, 1024  ;;  %p762_p2 = scmp.lt.s32.totalorder %s958_s7, %s958_s7 }
  0x1e   : > { %p755_p9 = scmp.ne.s32.totalorder %s958_s7, %s754_s19  ;;  %p763_p6 = scmp.lt.s32.totalorder %s754_s19, %s754_s19 }
  0x20   : > { %p757_p10 = pnand %p755_p9, %p743_p13  ;;  %p764_p4 = por %p763_p6, %p762_p2 }
  0x22   : > { %p758_p1 = pneg %p757_p10 }
  0x24   : > { %p765_p8 = pnand %p764_p4, %p758_p1 }
  0x26   : > { %768 = shalt.err (!%p765_p8)
}
  0x27   : > { %s872_s20 = smov 128   ;;  %s873_s26 = smov 8  }
  0x28   : > { %684 = dma.hbm_to_vmem [thread:$0]  (!%p965_p11), %s1133_s4, 1024, %s958_s7, [#allocation6], %s872_s20, %s872_s20, %s873_s26  }
  0x29   : > { %p28_p2 = scmp.eq.s32.totalorder %s27_s11, 0  ;;  %p37_p1 = scmp.ne.s32.totalorder %s865_s23, %s861_s22 }
  0x2a   : > { %p38_p4 = scmp.eq.s32.totalorder %s869_s24, 0  ;;  %p694_p6 = scmp.lt.s32.totalorder %s869_s24, 2 }
  0x2b   : > { %s1001_s13 = scalar_select %p28_p2, %s865_s23, %s30_s10  }
  0x2c   : > { %p39_p8 = por %p38_p4, %p37_p1  ;;  %p1143_p10 = scmp.eq.s32.totalorder %s935_s25, 1 }
  0x2d   : > { %s225_s15 = sand.u32 1, %s865_s23   ;;  %s625_s16 = sshll.u32 %s869_s24, 8 }
  0x2e   : > { %p1005_p12 = por %p1143_p10, %p37_p1  ;;  %s607_s17 = sshll.u32 %s225_s15, 4 }
  0x2f   : > { %s1014_s19 = scalar_lea.hbm %s1129_s0, %s625_s16  ;;  %s229_s7 = scalar_lea.vmem [#allocation2], %s607_s17 }
  0x30   : > { %s237_s10 = sshll.u32 %s229_s7, 4  ;;  %p1016_p11 = pnand %p694_p6, %p39_p8  ;;  %s1020_s10 = int_to_ptr.vmem [resolvable:$true] %s237_s10 }
  0x31   : > { %s226_s20 = scalar_lea.sflag [#allocation3], %s225_s15  ;;  %s769_s26 = scalar_lea.hbm %s1014_s19, 256 }
  0x32   : > { %p770_p13 = scmp.ne.s32.totalorder %s1014_s19, %s769_s26  ;;  %p771_p0 = pneg %p1016_p11 }
  0x33   : > { %s774_s16 = scalar_lea.hbm %s1129_s0, 512  ;;  %p775_p7 = scmp.lt.u32.totalorder %s1014_s19, %s1129_s0 }
  0x34   : > { %p772_p3 = pnand %p771_p0, %p770_p13  ;;  %p776_p9 = scmp.lt.u32.totalorder %s774_s16, %s769_s26 }
  0x35   : > { %p778_p1 = scmp.lt.u32.totalorder %s769_s26, %s1014_s19 }
  0x36   : > { %p773_p5 = pneg %p772_p3  ;;  %p777_p2 = por %p776_p9, %p775_p7 }
  0x38   : > { %p779_p4 = por %p778_p1, %p777_p2 }
  0x3a   : > { %p780_p6 = pnand %p779_p4, %p773_p5 }
  0x3c   : > { %783 = shalt.err (!%p780_p6)
}
  0x3d   : > { %s784_s15 = scalar_lea.vmem %s1020_s10, 256  ;;  %s874_s18 = smov [#allocation2]  }
  0x3e   : > { %p785_p8 = scmp.ne.s32.totalorder %s1020_s10, %s784_s15  ;;  %s789_s7 = sshll.u32 %s874_s18, 4  ;;  %s790_s7 = int_to_ptr.vmem [resolvable:$false] %s789_s7 }
  0x3f   : > { %s791_s30 = scalar_lea.vmem %s790_s7, 512  ;;  %p792_p3 = scmp.lt.s32.totalorder %s1020_s10, %s790_s7 }
  0x40   : > { %p787_p10 = pnand %p785_p8, %p771_p0  ;;  %p793_p7 = scmp.lt.s32.totalorder %s791_s30, %s784_s15 }
  0x42   : > { %p788_p13 = pneg %p787_p10  ;;  %p794_p9 = por %p793_p7, %p792_p3 }
  0x44   : > { %p795_p2 = pnand %p794_p9, %p788_p13 }
  0x46   : > { %798 = shalt.err (!%p795_p2)
}
  0x47   : > { %688 = dma.hbm_to_vmem [thread:$0]  (!%p1016_p11), %s1014_s19, 256, %s1020_s10, %s226_s20  }
  0x48   : > { %p1146_p5 = scmp.ne.s32.totalorder %s1141_s29, 0 }
  0x49   : > { %s1050_s26 = sand.u32 (!%p1146_p5), 1, %s861_s22   ;;  %p1147_p0 = scmp.ne.s32.totalorder (!%p1146_p5), %s1139_s27, 0 }
  0x4a   : > { %253 = sbr.rel (%p1146_p5) target bundleno = 581 (0x245), region = 44  ;;  %s611_s12 = sshll.u32 (!%p1146_p5), %s1050_s26, 4 }
  0x4b   : > { %s256_s16 = scalar_lea.sflag (!%p1146_p5), [#allocation3], %s1050_s26  ;;  %s1054_s17 = scalar_lea.vmem (!%p1146_p5), [#allocation2], %s611_s12 }
  0x51   : > { %844 = dma.done.wait (%p1147_p0), %s256_s16, 256  }
  0x52   : > { %846 = vsyncadd (%p1147_p0), %s256_s16, 4294967040  ;;  %p1148_p11 = scmp.eq.s32.totalorder %s935_s25, 0 }
  0x54   : > { %848 = dma.done.wait (%p1148_p11), [#allocation6], 1024   ;;  %p1149_p1 = pmov %p1148_p11 }
  0x55   : > { %p296_p4 = scmp.lt.s32.totalorder %s935_s25, 1  ;;  %v875_v0 = vmov 0.0   ;;  %vm876_vm0 = vmmov 0   ;;  %vm315_vm1 = vcmask 1044480   ;;  %vm311_vm2 = vcmask 39936   ;;  %v394_v3 = vld [vmem:[#allocation5] sm:$0xff] }
  0x56   : > { %850 = vsyncadd (%p1149_p1), [#allocation6], 4294966272  ;;  %637 = vmatprep.subr.mxu0 %v875_v0  ;;  %639 = vmatprep.mubr.msk.f32.mxu0 %vm876_vm0, %v875_v0  ;;  %v303_v1 = vld [vmem:[%s1131_s2] sm:$0x1f]  ;;  %v395_v4 = vld [vmem:[#allocation5 + $0x8] sm:$0xff]  ;;  %v877_v6 = vmov 0.0|0.0  }
  0x57   : > { %s297_s29 = scalar_select %p296_p4, %s935_s25, 1  ;;  %658 = vmatprep.mubr.msk.f32.mxu1 %vm876_vm0, %v875_v0  ;;  %638 = vmatpush3.msk.msra.mxu0 %vm315_vm1, %v303_v1  ;;  %v662_v5 = vpack.c.bf16 %v395_v4, %v394_v3  ;;  %v396_v7 = vld [vmem:[#allocation5 + $0x10] sm:$0xff]  ;;  %v397_v8 = vld [vmem:[#allocation5 + $0x18] sm:$0xff]  ;;  %v398_v10 = vld [vmem:[#allocation5 + $0x20] sm:$0xff]  ;;  %vm409_vm3 = vcmask 523264  }
  0x58   : > { %661 = vmatprep.subr.bf16.mxu1 %v877_v6  ;;  %v665_v9 = vpack.c.bf16 %v397_v8, %v396_v7  ;;  %v399_v11 = vld [vmem:[#allocation5 + $0x28] sm:$0xff]  ;;  %v400_v13 = vld [vmem:[#allocation5 + $0x30] sm:$0xff]  ;;  %v401_v14 = vld [vmem:[#allocation5 + $0x38] sm:$0xff]  ;;  %s613_s12 = sshll.u32 %s1050_s26, 3  ;;  %s622_s16 = sshll.u32 %s935_s25, 7 }
  0x59   : > { %s614_s19 = sshll.u32 %s297_s29, 3  ;;  %663 = vmatpush3.bf16.msra.mxu1 %v662_v5  ;;  %v668_v12 = vpack.c.bf16 %v399_v11, %v398_v10  ;;  %v671_v15 = vpack.c.bf16 %v401_v14, %v400_v13  ;;  %v615_v16 = vld [vmem:[%s1132_s3] ss:$0 sm:$0xff]  ;;  %v301_v26 = vld [vmem:[%s1054_s17 + $0x8] sm:$0xff]  ;;  %s295_s29 = scalar_lea.vmem [#allocation7], %s613_s12 }
  0x5a   : > { %s299_s11 = scalar_lea.vmem %s1130_s1, %s614_s19  ;;  %664 = vmatprep.subr.bf16.mxu1 %v877_v6  ;;  %v618_v25 = vld [vmem:[%s1134_s5] ss:$0 sm:$0xff]  ;;  %s511_s19 = sshll.u32 %s295_s29, 4  ;;  %s1087_s19 = int_to_ptr.vmem [resolvable:$true] %s511_s19 }
  0x5b   : > { %v302_v2 = vld [vmem:[%s299_s11] sm:$0xff]  ;;  %s498_s11 = scalar_lea.sflag [#allocation4], %s1050_s26  ;;  %s799_s20 = scalar_lea.vmem %s1087_s19, 128 }
  0x5c   : > { %640 = vmatmul.mubr.msk.f32.vlgmr.msra.gmra.mrb[0].mxu0 %vm311_vm2, %v302_v2  ;;  %v300_v32 = vld [vmem:[%s1054_s17] sm:$0xff]  ;;  %s1085_s17 = scalar_lea.hbm %s1135_s6, %s622_s16  ;;  %p800_p6 = scmp.ne.s32.totalorder %s1087_s19, %s799_s20 }
  0x5d   : > { %666 = vmatpush3.bf16.msra.mxu1 %v665_v9  ;;  %v483_v33 = vadd.f32 3.0, %v300_v32  ;;  %s878_s25 = smov [#allocation7]  }
  0x5e   : > { %667 = vmatprep.subr.bf16.mxu1 %v877_v6  ;;  %p801_p8 = pnand %p800_p6, %p1005_p12  ;;  %s803_s8 = sshll.u32 %s878_s25, 4  ;;  %s804_s8 = int_to_ptr.vmem [resolvable:$false] %s803_s8 }
  0x5f   : > { %v484_v34 = vmax.f32 %v483_v33, 0.0  ;;  %s805_s15 = scalar_lea.vmem %s804_s8, 256  ;;  %p806_p13 = scmp.lt.s32.totalorder %s1087_s19, %s804_s8 }
  0x60   : > { %p802_p10 = pneg %p801_p8  ;;  %p807_p3 = scmp.lt.s32.totalorder %s805_s15, %s799_s20 }
  0x61   : > { %669 = vmatpush3.bf16.msra.mxu1 %v668_v12  ;;  %v485_v37 = vmin.f32 %v484_v34, 6.0 }
  0x62   : > { %670 = vmatprep.subr.bf16.mxu1 %v877_v6  ;;  %p808_p7 = por %p807_p3, %p806_p13 }
  0x63   : > { %v486_v38 = vmul.f32 %v485_v37, %v300_v32 }
  0x64   : > { %p809_p9 = pnand %p808_p7, %p802_p10 }
  0x65   : > { %672 = vmatpush3.bf16.msra.mxu1 %v671_v15  ;;  %v487_v39 = vmul.f32 0.16666667, %v486_v38 }
 0x12f   : > { %v385_v17 = vpop.f32.mrb[0].mxu0 }
 0x130   : > { %v386_v18 = vadd.f32 %v615_v16, %v385_v17  ;;  %v641_v19 = vpop.f32.mrb[1].mxu0 }
 0x132   : > { %v390_v20 = vmul.f32 0.70710677, %v386_v18  ;;  %v389_v22 = vmul.f32 0.5, %v386_v18 }
 0x134   : > { %735 = verf.f32 %v390_v20 }
 0x13e   : > { %v736_v21 = vpop.eup %735 }
 0x13f   : > { %v392_v23 = vadd.f32 1.0, %v736_v21 }
 0x141   : > { %v393_v24 = vmul.f32 %v392_v23, %v389_v22 }
 0x143   : > { %659 = vmatmul.mubr.msk.f32.vlgmr.msra.gmra.mrb[0].mxu1 %vm409_vm3, %v393_v24 }
 0x216   : > { %v479_v27 = vpop.f32.mrb[0].mxu1 }
 0x217   : > { %v480_v28 = vadd.f32 %v618_v25, %v479_v27  ;;  %v660_v29 = vpop.f32.mrb[1].mxu1 }
 0x219   : > { %v488_v30 = vadd.f32 %v480_v28, %v301_v26 }
 0x21b   : > { %v620_v31 = vmul.f32 -1.442695, %v488_v30 }
 0x21d   : > { %737 = vpow2.f32 %v620_v31 }
 0x227   : > { %v738_v35 = vpop.eup %737 }
 0x228   : > { %v492_v36 = vadd.f32 1.0, %v738_v35 }
 0x22a   : > { %739 = vrcp.f32 %v492_v36 }
 0x234   : > { %v740_v40 = vpop.eup %739 }
 0x235   : > { %v495_v41 = vmul.f32 %v740_v40, %v487_v39 }
 0x237   : > { %496 = vst [vmem:[%s295_s29] sm:$0xff] %v495_v41 }
 0x238   : > { %812 = shalt.err (!%p809_p9)
}
 0x239   : > { %s813_s26 = scalar_lea.hbm %s1085_s17, 128  ;;  %s817_s30 = scalar_lea.hbm %s1135_s6, 256 }
 0x23a   : > { %p814_p2 = scmp.ne.s32.totalorder %s1085_s17, %s813_s26  ;;  %p818_p11 = scmp.lt.u32.totalorder %s1085_s17, %s1135_s6 }
 0x23b   : > { %p819_p1 = scmp.lt.u32.totalorder %s817_s30, %s813_s26  ;;  %p821_p6 = scmp.lt.u32.totalorder %s813_s26, %s1085_s17 }
 0x23c   : > { %p815_p5 = pnand %p814_p2, %p1005_p12 }
 0x23d   : > { %p820_p4 = por %p819_p1, %p818_p11 }
 0x23e   : > { %p816_p0 = pneg %p815_p5 }
 0x23f   : > { %p822_p8 = por %p821_p6, %p820_p4 }
 0x241   : > { %p823_p10 = pnand %p822_p8, %p816_p0 }
 0x243   : > { %826 = shalt.err (!%p823_p10)
}
 0x244   : > { %679 = dma.vmem_to_hbm [thread:$0]  (%p1005_p12), %s1087_s19, 128, %s1085_s17, %s498_s11  }
 0x245 PF: > { %s523_s29 = sand.u32 1, %s857_s21   ;;  %p1150_p13 = scmp.ne.s32.totalorder %s1140_s28, 0 }
 0x246   : > { %p1151_p3 = scmp.ge.s32.totalorder %s869_s24, 2  ;;  %s524_s10 = scalar_lea.sflag [#allocation4], %s523_s29 }
 0x248   : > { %p690_p7 = pnand %p1151_p3, %p1150_p13 }
 0x24a   : > { %852 = dma.done.wait (!%p690_p7), %s524_s10, 128  }
 0x24b   : > { %854 = vsyncadd (!%p690_p7), %s524_s10, 4294967168  ;;  %p20_p9 = scmp.ge.s32.totalorder %s970_s9, 4   ;;  %s1152_s21 = smov %s861_s22 }
 0x24c   : > { %s1153_s22 = smov %s865_s23  ;;  %s1154_s23 = smov %s1001_s13 }
 0x24d   : > { %s1155_s24 = smov %s970_s9  ;;  %22 = sbr.rel (!%p20_p9) target bundleno = 6 (0x6), region = 96 }
 0x254   :  { %529 = vsyncpa [#allocation3], 1 }
 0x255   :  { %531 = vsyncpa [#allocation3 + $0x1], 1 }
 0x256   :  { %532 = vsyncpa [#allocation6], 1 }
 0x257   :  { %533 = vsyncpa [#allocation4], 1 }
 0x258   :  { %535 = vsyncpa [#allocation4 + $0x1], 1 }

</bundles_post_ra>
